<compile_context>
chip_gen: v5e
topology: v5e:2x2
jax: 0.10.0
libtpu: 0.0.40
codegen_flags: <defaults>
</compile_context>

<pallas_src>
import functools

import numpy as np
import jax
import jax.numpy as jnp
from jax.experimental import pallas as pl
from jax.experimental.pallas import tpu as pltpu


# ---------------------------------------------------------------------------
# Kernel body (elementwise tiled path)
# ---------------------------------------------------------------------------
def _lambda_kernel(x_ref, o_ref, *, func):
    y = func(x_ref[...])
    if y.dtype != o_ref.dtype:      # only pay the cast when dtypes actually differ
        y = y.astype(o_ref.dtype)
    o_ref[...] = y


# ---------------------------------------------------------------------------
# Trace-time classification of the wrapped function
# ---------------------------------------------------------------------------
_METADATA_PRIMS = frozenset({"reshape", "squeeze", "expand_dims", "copy"})

_ELEMENTWISE_PRIMS = frozenset({
    "add", "sub", "mul", "div", "rem", "max", "min", "neg", "abs", "sign",
    "exp", "exp2", "log", "log1p", "expm1", "tanh", "logistic",
    "erf", "erfc", "erf_inv", "sqrt", "rsqrt", "cbrt",
    "pow", "integer_pow", "square",
    "sin", "cos", "tan", "asin", "acos", "atan",
    "sinh", "cosh", "asinh", "acosh", "atanh",
    "floor", "ceil", "round", "clamp", "nextafter",
    "eq", "ne", "ge", "gt", "le", "lt",
    "and", "or", "xor", "not",
    "shift_left", "shift_right_logical", "shift_right_arithmetic",
    "select_n", "is_finite",
    "convert_element_type", "broadcast_in_dim", "copy",
    "pjit", "custom_jvp_call", "custom_vjp_call",
})

# Prims that hit the EUP / transcendental path (for the cost estimate only).
_TRANSCENDENTAL_PRIMS = frozenset({
    "exp", "exp2", "log", "log1p", "expm1", "tanh", "logistic",
    "erf", "erfc", "erf_inv", "sqrt", "rsqrt", "cbrt", "pow",
    "sin", "cos", "tan", "asin", "acos", "atan",
    "sinh", "cosh", "asinh", "acosh", "atanh",
})


def _walk_jaxpr(jaxpr, prims, fingerprint):
    """Collect primitive names + scalar literal values (recursing into sub-jaxprs)."""
    ok = True
    for eqn in jaxpr.eqns:
        prims.add(eqn.primitive.name)
        lits = []
        for v in eqn.invars:
            val = getattr(v, "val", None)
            if val is not None:
                arr = np.asarray(val)
                if arr.ndim != 0:
                    ok = False
                else:
                    lits.append(arr.item())
        fingerprint.append((eqn.primitive.name, tuple(lits)))
        for p in eqn.params.values():
            ok &= _walk_param(p, prims, fingerprint)
    return ok


def _walk_param(p, prims, fingerprint):
    inner = getattr(p, "jaxpr", None)
    if inner is not None and hasattr(inner, "eqns"):
        return _walk_jaxpr(inner, prims, fingerprint)
    if hasattr(p, "eqns"):
        return _walk_jaxpr(p, prims, fingerprint)
    if isinstance(p, (list, tuple)):
        ok = True
        for q in p:
            ok &= _walk_param(q, prims, fingerprint)
        return ok
    return True


def _probe_shape(shape):
    """A small 2-D shape whose dims differ from x's dims (and total size)."""
    forbidden = {int(d) for d in shape}
    forbidden.add(int(np.prod(shape)) if len(shape) else 1)
    r = 8
    while r in forbidden:
        r += 8
    c = 128
    while c in forbidden or (r * c) in forbidden:
        c += 128
    return r, c


def _analyze(func, x):
    """Classify func as 'metadata', 'elementwise' or 'general' (always safe).

    Returns (kind, out_aval, stats) where stats feeds the pl.CostEstimate.
    """
    out_aval = jax.eval_shape(func, x)
    kind = "general"
    stats = {"n_ops": 1, "n_trans": 0}
    try:
        closed = jax.make_jaxpr(func)(x)
        prims, fp = set(), []
        ok = _walk_jaxpr(closed.jaxpr, prims, fp)
        consts_ok = all(np.ndim(c) == 0 for c in closed.consts)

        stats = {
            "n_ops": max(1, len(fp)),
            "n_trans": sum(1 for name, _ in fp if name in _TRANSCENDENTAL_PRIMS),
        }

        same_size = int(np.prod(out_aval.shape)) == int(np.prod(x.shape))
        if ok and consts_ok and prims <= _METADATA_PRIMS and same_size \
                and out_aval.dtype == x.dtype:
            kind = "metadata"
        elif ok and consts_ok and prims <= _ELEMENTWISE_PRIMS \
                and out_aval.shape == x.shape:
            # Shape-invariance probe: retrace at an unrelated 2-D shape and
            # require an identical op/literal fingerprint.  Catches lambdas
            # that bake x.shape (or captured per-axis tensors) into the math.
            pr, pc = _probe_shape(x.shape)
            probe = jnp.zeros((pr, pc), x.dtype)
            closed_p = jax.make_jaxpr(func)(probe)
            prims_p, fp_p = set(), []
            ok_p = _walk_jaxpr(closed_p.jaxpr, prims_p, fp_p)
            out_p = jax.eval_shape(func, probe)
            if ok_p and fp_p == fp and out_p.shape == probe.shape:
                kind = "elementwise"
    except Exception:
        kind = "general"   # any trace hiccup -> always-correct XLA path
    return kind, out_aval, stats


# ---------------------------------------------------------------------------
# Tiling choices for the elementwise path
# ---------------------------------------------------------------------------
_LANE_CANDIDATES = (8192, 4096, 2048, 1024, 512, 256, 128)


@functools.lru_cache(maxsize=None)
def _vmem_limit_bytes():
    """Scoped VMEM limit: generous but always well under physical VMEM.

    48 MiB cap works for v5e/v6e (128 MiB physical) and stays <= 3/4 of
    v7x's 64 MiB physical VMEM.
    """
    cap = 64 << 20   # conservative default == v7x per-TC physical VMEM
    try:
        info = pltpu.get_tpu_info()
        cap = int(getattr(info, "vmem_capacity_bytes", cap))
    except Exception:
        pass
    return min(48 << 20, (cap * 3) // 4)


def _target_tile_bytes():
    # (in + out) x 2 double-buffers = 4 live tiles; keep them at <= half the
    # scoped limit so the compiler has headroom for internal scratch.
    return max(1 << 20, _vmem_limit_bytes() // 8)   # 6 MiB under the 48 MiB cap


def _choose_2d_layout(total):
    """Return (rows, lanes, padded_total) with rows a multiple of 8.

    Prefers the widest lane-dense layout that needs no padding; otherwise pads
    the flattened array to a multiple of 1024 (8 sublanes x 128 lanes) so odd
    sizes stay on the pipelined fast path.
    """
    if total <= 0:
        return None
    for lanes in _LANE_CANDIDATES:
        if total % lanes == 0:
            rows = total // lanes
            if rows >= 8 and rows % 8 == 0:
                return rows, lanes, total
    padded = ((total + 1023) // 1024) * 1024
    for lanes in _LANE_CANDIDATES:
        if padded % lanes == 0:
            rows = padded // lanes
            if rows >= 8 and rows % 8 == 0:
                return rows, lanes, padded
    # padded is a multiple of 1024, so lanes=128 always lands here at the latest
    return padded // 128, 128, padded


def _pick_tile_rows(rows, lanes, in_itemsize, out_itemsize, target_bytes):
    """Largest sublane-aligned tile under the byte budget.

    - caps at ~rows/2 so the 1-D "parallel" grid always has >= 2 blocks
      (both v7x TensorCores get work; neutral on v5e/v6e),
    - prefers a tile that divides rows exactly (no masked partial last block),
      but never shrinks below half the budget just to find a divisor.
    """
    itemsize = max(in_itemsize, out_itemsize)
    pack = max(1, 4 // max(1, min(in_itemsize, out_itemsize)))
    sub = 8 * pack                          # sublane-packing friendly multiple
    if rows < 2 * sub:
        return rows                         # too small to split usefully

    budget = max(sub, (target_bytes // (lanes * itemsize)) // sub * sub)
    half_up = (((rows + 1) // 2) + sub - 1) // sub * sub
    budget = min(budget, half_up)

    # Prefer an exact divisor of rows within [budget/2, budget].
    t = budget
    floor_t = max(sub, (budget // 2 // sub) * sub)
    while t >= floor_t:
        if rows % t == 0:
            return t
        t -= sub
    # No nearby divisor: accept one masked partial last block at full budget.
    return budget


# ---------------------------------------------------------------------------
# The module
# ---------------------------------------------------------------------------
class Lambda:
    """JAX/Pallas port of the PyTorch Lambda(nn.Module): forward(x) = func(x).

    `elementwise=False` force-disables the tiled Pallas path.  (A True hint no
    longer bypasses the shape-invariance probe — forcing a non-pointwise func
    through the tiled path would be silently wrong.)
    """

    def __init__(self, func, elementwise=None):
        self.func = func
        self._elementwise_hint = elementwise
        self._analysis_cache = {}           # (shape, dtype) -> (kind, out_aval, stats)

    # -- cached classification ------------------------------------------------
    def _classify(self, x):
        key = (tuple(int(d) for d in x.shape), str(jnp.result_type(x)))
        hit = self._analysis_cache.get(key)
        if hit is None:
            hit = _analyze(self.func, x)
            self._analysis_cache[key] = hit
        return hit

    def __call__(self, x):
        kind, out_aval, stats = self._classify(x)
        if self._elementwise_hint is False and kind == "elementwise":
            kind = "general"

        if kind == "metadata":
            # Pure view/reshape lambda: XLA metadata, no HBM round-trip needed.
            return self.func(x)

        if kind == "elementwise":
            y = self._call_elementwise_tiled(x, out_aval.dtype, stats)
            if y is not None:
                return y

        # General fallback: hand the whole op to XLA (tiled/fused by the
        # compiler).  An un-pipelined single-block pallas_call would be slower
        # and a VMEM-overflow hazard on v7x/v5e for large inputs.
        return self.func(x)

    # -- lane-dense, 1-D-parallel-grid tiled path (elementwise only) ----------
    def _call_elementwise_tiled(self, x, out_dtype, stats):
        total = int(np.prod(x.shape))
        layout = _choose_2d_layout(total)
        if layout is None:
            return None
        rows, lanes, padded = layout

        in_isz = np.dtype(x.dtype).itemsize
        out_isz = np.dtype(out_dtype).itemsize
        tile_rows = _pick_tile_rows(rows, lanes, in_isz, out_isz, _target_tile_bytes())
        grid_m = pl.cdiv(rows, tile_rows)

        flat = x.reshape(-1)                 # free metadata reshape, outside kernel
        if padded != total:
            flat = jnp.pad(flat, (0, padded - total))   # keep odd sizes on fast path
        x2 = flat.reshape(rows, lanes)

        kernel = functools.partial(_lambda_kernel, func=self.func)
        cost = pl.CostEstimate(
            flops=stats["n_ops"] * total,
            transcendentals=stats["n_trans"] * total,
            bytes_accessed=total * (in_isz + out_isz),
        )
        # NOTE: no input_output_aliases — x stays live at the call site, so
        # aliasing would require donation the caller did not opt into.
        y2 = pl.pallas_call(
            kernel,
            out_shape=jax.ShapeDtypeStruct((rows, lanes), out_dtype),
            grid=(grid_m,),
            in_specs=[pl.BlockSpec((tile_rows, lanes), lambda i: (i, 0))],
            out_specs=pl.BlockSpec((tile_rows, lanes), lambda i: (i, 0)),
            compiler_params=pltpu.CompilerParams(
                dimension_semantics=("parallel",),      # megacore sharding on v7x
                vmem_limit_bytes=_vmem_limit_bytes(),   # room for 2x(in+out) buffers
            ),
            cost_estimate=cost,
        )(x2)

        if padded != total:
            return y2.reshape(-1)[:total].reshape(x.shape)
        return y2.reshape(x.shape)


if __name__ == "__main__":
    key = jax.random.PRNGKey(0)
    # Small NCHW input consistent with a CNN forward pass.
    x = jax.random.normal(key, (2, 4, 16, 16), dtype=jnp.float32)
    # Odd-sized input (not a multiple of 128) to exercise the padded fast path.
    x_odd = jax.random.normal(jax.random.PRNGKey(1), (2, 3, 15, 15), dtype=jnp.float32)

    # Representative Lambda instantiations from the classic CNN.py usage:
    #  1) elementwise activation Lambdas (go through the tiled Pallas kernel)
    #  2) the flatten Lambda (lambda x: x.view(x.size(0), -1)) -> metadata bypass
    relu_lambda = Lambda(lambda t: jnp.maximum(t, 0.0))
    swish_lambda = Lambda(lambda t: t * jax.nn.sigmoid(t))
    flatten_lambda = Lambda(lambda t: t.reshape(t.shape[0], -1))

    y_relu = jax.block_until_ready(relu_lambda(x))
    y_swish = jax.block_until_ready(swish_lambda(x))
    y_flat = jax.block_until_ready(flatten_lambda(x))
    y_relu_odd = jax.block_until_ready(relu_lambda(x_odd))

    # Reference checks against plain JAX.
    ref_relu = jnp.maximum(x, 0.0)
    ref_swish = x * jax.nn.sigmoid(x)
    ref_flat = x.reshape(x.shape[0], -1)
    ref_relu_odd = jnp.maximum(x_odd, 0.0)

    assert y_relu.shape == ref_relu.shape and y_relu.dtype == ref_relu.dtype
    assert jnp.allclose(y_relu, ref_relu, atol=0, rtol=0)
    assert y_swish.shape == ref_swish.shape and y_swish.dtype == ref_swish.dtype
    assert jnp.allclose(y_swish, ref_swish, atol=1e-5, rtol=1e-5)
    assert y_flat.shape == (2, 4 * 16 * 16) and y_flat.dtype == x.dtype
    assert jnp.array_equal(y_flat, ref_flat)
    assert y_relu_odd.shape == ref_relu_odd.shape
    assert jnp.allclose(y_relu_odd, ref_relu_odd, atol=0, rtol=0)

    print("KERNEL_OK")
</pallas_src>

<mosaic_0001>
module attributes {stable_mosaic.version = 11 : i64} {
  func.func @_lambda_kernel(%arg0: i32, %arg1: memref<8x256xf32, #tpu.memory_space<vmem>>, %arg2: memref<8x256xf32, #tpu.memory_space<vmem>>) attributes {dimension_semantics = [#tpu.dimension_semantics<parallel>], iteration_bounds = array<i64: 1>, scalar_prefetch = 0 : i64, scratch_operands = 0 : i64, tpu.core_type = #tpu.core_type<tc>, window_params = [{transform_indices = @transform_0, window_bounds = array<i64: 8, 256>}, {transform_indices = @transform_1, window_bounds = array<i64: 8, 256>}]} {
    %c0 = arith.constant 0 : index
    %c0_0 = arith.constant 0 : index
    %0 = vector.load %arg1[%c0, %c0_0] : memref<8x256xf32, #tpu.memory_space<vmem>>, vector<8x256xf32>
    %cst = arith.constant 0.000000e+00 : f32
    %1 = vector.broadcast %cst : f32 to vector<8x256xf32>
    %2 = arith.maximumf %0, %1 : vector<8x256xf32>
    %c0_1 = arith.constant 0 : index
    %c0_2 = arith.constant 0 : index
    %3 = vector.load %arg2[%c0_1, %c0_2] : memref<8x256xf32, #tpu.memory_space<vmem>>, vector<8x256xf32>
    tpu.vector_store %arg2[%c0_1, %c0_2], %2 {strides = array<i32>} : memref<8x256xf32, #tpu.memory_space<vmem>>, vector<8x256xf32>,
    return
  }
  func.func @transform_0(%arg0: i32) -> (i32, i32) {
    %c0_i32 = arith.constant 0 : i32
    %c0_i32_0 = arith.constant 0 : i32
    return %arg0, %c0_i32 : i32, i32
  }
  func.func @transform_1(%arg0: i32) -> (i32, i32) {
    %c0_i32 = arith.constant 0 : i32
    %c0_i32_0 = arith.constant 0 : i32
    return %arg0, %c0_i32 : i32, i32
  }
}

</mosaic_0001>

<bundles_post_ra>
// kernel: tpu_custom_call.1
= control target key start
LH: loop header
LB: loop body
LE: loop exit
PB: predicated region body
PF: predicated region fallthrough
CT: control target
= control target key end

     0   :  { %6 = vsyncpa [#allocation3], 0  ;;  %s118_s0 = inlined_call_operand.hbm [shape: f32[8,256], index: 0, kind: input, shape index: {}]   ;;  %s119_s1 = inlined_call_operand.hbm [shape: f32[8,256], index: 1, kind: output, shape index: {}]  }
   0x1   :  { %7 = vsyncpa [#allocation4], 0  ;;  %s13_s8 = sshll.u32 %s118_s0, 4  ;;  %s100_s9 = smov [#allocation2]   ;;  %s14_s8 = int_to_ptr.hbm [resolvable:$true] %s13_s8 }
   0x2   :  { %s15_s10 = sshll.u32 %s100_s9, 4  ;;  %s16_s10 = int_to_ptr.vmem [resolvable:$true] %s15_s10 }
   0x3   :  { %18 = dma.hbm_to_vmem [thread:$0]  %s14_s8, 256, %s16_s10, [#allocation3]  }
   0x4   :  { %96 = dma.done.wait [#allocation3], 256  }
   0x5   :  { %97 = vsyncadd [#allocation3], 4294967040  ;;  %s101_s11 = smov [#allocation5]   ;;  %s36_s15 = sshll.u32 %s119_s1, 4  ;;  %v23_v0 = vld [vmem:[#allocation2] sm:$0xff]  ;;  %v24_v1 = vld [vmem:[#allocation2 + $0x8] sm:$0xff]  ;;  %s37_s15 = int_to_ptr.hbm [resolvable:$true] %s36_s15 }
   0x6   :  { %s34_s12 = sshll.u32 %s101_s11, 4  ;;  %v25_v2 = vmax.f32 %v23_v0, 0.0  ;;  %v26_v3 = vmax.f32 %v24_v1, 0.0  ;;  %s35_s12 = int_to_ptr.vmem [resolvable:$true] %s34_s12 }
   0x8   :  { %27 = vst [vmem:[#allocation5] sm:$0xff] %v25_v2 }
   0x9   :  { %28 = vst [vmem:[#allocation5 + $0x8] sm:$0xff] %v26_v3 }
   0xa   :  { %39 = dma.vmem_to_hbm [thread:$0]  %s35_s12, 256, %s37_s15, [#allocation4]  }
   0xb   :  { %98 = dma.done.wait [#allocation4], 256  }
   0xc   :  { %99 = vsyncadd [#allocation4], 4294967040 }
   0xd   :  { %44 = vsyncpa [#allocation3], 1 }
   0xe   :  { %45 = vsyncpa [#allocation4], 1 }

</bundles_post_ra>
